<compile_context>
chip_gen: v7x
topology: tpu7x:2x2x1
jax: 0.10.0
libtpu: 0.0.40
codegen_flags: <defaults>
</compile_context>

<pallas_src>
import functools

import jax
import jax.numpy as jnp
from jax.experimental import pallas as pl
from jax.experimental.pallas import tpu as pltpu

_LN_EPS = 1e-5  # PyTorch LayerNorm default

# Resident-table path limits: one-hot intermediate is (TN, size) f32, and the
# padded table must comfortably fit VMEM on every generation.
_MAX_ONEHOT_SIZE = 1024
_MAX_RESIDENT_TABLE_BYTES = 8 * 1024 * 1024


def _round_up(x: int, m: int) -> int:
    return ((x + m - 1) // m) * m


# --------------------------------------------------------------------------
# Kernels
# --------------------------------------------------------------------------
def _resident_gather_kernel(ids_ref, table_ref, out_ref):
    # ids_ref   : (TN, 1)       int32   VMEM
    # table_ref : (size, d_pad) float32 VMEM (resident: constant index_map)
    # out_ref   : (TN, d_pad)   float32 VMEM
    ids = ids_ref[...]                                           # (TN, 1)
    tn = ids.shape[0]
    size = table_ref.shape[0]
    col = jax.lax.broadcasted_iota(jnp.int32, (tn, size), 1)     # (TN, size)
    onehot = (col == ids).astype(table_ref.dtype)                # exact select
    out_ref[...] = jnp.dot(onehot, table_ref[...],
                           preferred_element_type=jnp.float32)


def _streaming_gather_kernel(ids_ref, row_ref, out_ref):
    # Large-table fallback: one data-dependent row DMA per grid step.
    # ids_ref : (N,)        int32   SMEM (scalar prefetch; used by index_maps)
    # row_ref : (1, D_pad)  float32 VMEM — gathered table row for this step
    # out_ref : (1, D_pad)  float32 VMEM
    # TODO(synk): batch 8-16 row DMAs per step via manual make_async_copy to
    # hide per-row DMA latency and get sublane-dense stores in this fallback.
    del ids_ref
    out_ref[...] = row_ref[...]


# --------------------------------------------------------------------------
# Wrappers
# --------------------------------------------------------------------------
def prepare_embedding_table(table: jax.Array, normalize: bool = True):
    """One-time (init-time) preparation of the embedding table.

    Applies the affine-free LayerNorm to the table rows (valid because LN is
    per-row: LN(table)[idx] == LN(table[idx])) and zero-pads the embedding dim
    to a multiple of 128 lanes.  Returns (table_padded, real_d).
    """
    table = table.astype(jnp.float32)
    _, d = table.shape
    if normalize:
        mean = jnp.mean(table, axis=-1, keepdims=True)
        var = jnp.mean((table - mean) ** 2, axis=-1, keepdims=True)  # biased
        table = (table - mean) * jax.lax.rsqrt(var + _LN_EPS)
    d_pad = _round_up(max(d, 1), 128)
    table_p = jnp.pad(table, ((0, 0), (0, d_pad - d)))
    return table_p, d


def embedding_lookup(indices: jax.Array, table_p: jax.Array, real_d: int,
                     *, block_rows: int = 512,
                     force_streaming: bool = False) -> jax.Array:
    """Gather prepared table rows.  indices: (N,) int; returns (N, real_d) f32."""
    n = indices.shape[0]
    size, d_pad = table_p.shape

    # Clamp so the (fallback) gather DMA can never go out of bounds.
    # NOTE: torch.nn.Embedding raises on out-of-range codes instead.
    idx = jnp.clip(indices.astype(jnp.int32), 0, size - 1)

    use_resident = ((not force_streaming)
                    and size <= _MAX_ONEHOT_SIZE
                    and table_p.size * 4 <= _MAX_RESIDENT_TABLE_BYTES)

    if use_resident:
        tn = _round_up(min(block_rows, _round_up(n, 8)), 8)
        n_pad = _round_up(n, tn)
        idx2 = jnp.pad(idx, (0, n_pad - n)).reshape(n_pad, 1)

        out = pl.pallas_call(
            _resident_gather_kernel,
            out_shape=jax.ShapeDtypeStruct((n_pad, d_pad), jnp.float32),
            grid=(n_pad // tn,),
            in_specs=[
                pl.BlockSpec((tn, 1), lambda i: (i, 0)),          # row codes
                pl.BlockSpec((size, d_pad), lambda i: (0, 0)),    # resident table
            ],
            out_specs=pl.BlockSpec((tn, d_pad), lambda i: (i, 0)),
            compiler_params=pltpu.CompilerParams(
                dimension_semantics=("parallel",),  # v7x: split row blocks over 2 TCs
            ),
        )(idx2, table_p)
        return out[:n, :real_d]

    # ---- Large-table fallback: data-dependent per-row gather (P2). ----
    out = pl.pallas_call(
        _streaming_gather_kernel,
        out_shape=jax.ShapeDtypeStruct((n, d_pad), jnp.float32),
        grid_spec=pltpu.PrefetchScalarGridSpec(
            num_scalar_prefetch=1,            # idx -> SMEM for the index_maps
            grid=(n,),
            in_specs=[
                pl.BlockSpec((pl.Element(1), d_pad),
                             lambda i, ids: (ids[i], 0)),
            ],
            out_specs=pl.BlockSpec((1, d_pad), lambda i, ids: (i, 0)),
        ),
        compiler_params=pltpu.CompilerParams(
            dimension_semantics=("parallel",),
        ),
    )(idx, table_p)
    return out[:, :real_d]


def embedding_forward(indices: jax.Array, table: jax.Array,
                      normalize: bool = True, **kwargs) -> jax.Array:
    """Convenience one-shot forward matching the PyTorch module.

    For repeated calls, do `prepare_embedding_table` once and call
    `embedding_lookup` (table normalization + padding are init-time costs).
    """
    table_p, d = prepare_embedding_table(table, normalize=normalize)
    return embedding_lookup(indices, table_p, d, **kwargs)


# --------------------------------------------------------------------------
# Demo / self-test
# --------------------------------------------------------------------------
if __name__ == "__main__":
    # Module config: size (N categories) = 16, cov_embed_dims = 10, normalize=True
    size = 16
    cov_embed_dims = 10
    batch = 8

    key = jax.random.PRNGKey(0)
    k_w, k_idx = jax.random.split(key)

    # torch.nn.Embedding default init: weight ~ N(0, 1)
    emb_table = jax.random.normal(k_w, (size, cov_embed_dims), dtype=jnp.float32)
    indices = jax.random.randint(k_idx, (batch,), 0, size, dtype=jnp.int32)

    # Pure-JAX reference (embedding lookup + affine-free LayerNorm, eps=1e-5)
    ref = emb_table[indices]
    mean = jnp.mean(ref, axis=-1, keepdims=True)
    var = jnp.mean((ref - mean) ** 2, axis=-1, keepdims=True)
    ref_ln = (ref - mean) / jnp.sqrt(var + _LN_EPS)

    # Init-time preparation (normalize + pad the table once).
    table_p, real_d = prepare_embedding_table(emb_table, normalize=True)

    # Fast resident-table path.
    out = jax.block_until_ready(embedding_lookup(indices, table_p, real_d))
    assert out.shape == (batch, cov_embed_dims)
    assert jnp.allclose(out, ref_ln, atol=2e-5, rtol=2e-5), (
        float(jnp.max(jnp.abs(out - ref_ln))))

    # Large-table streaming fallback (forced) — same result.
    out_stream = jax.block_until_ready(
        embedding_lookup(indices, table_p, real_d, force_streaming=True))
    assert jnp.allclose(out_stream, ref_ln, atol=2e-5, rtol=2e-5), (
        float(jnp.max(jnp.abs(out_stream - ref_ln))))

    # normalize=False path (pure gather).
    out_raw = jax.block_until_ready(
        embedding_forward(indices, emb_table, normalize=False))
    assert jnp.allclose(out_raw, emb_table[indices], atol=1e-6, rtol=1e-6)

    print("KERNEL_OK")
</pallas_src>

<mosaic_0001>
module attributes {stable_mosaic.version = 11 : i64} {
  func.func @_resident_gather_kernel(%arg0: i32, %arg1: memref<8x1xi32, #tpu.memory_space<vmem>>, %arg2: memref<16x128xf32, #tpu.memory_space<vmem>>, %arg3: memref<8x128xf32, #tpu.memory_space<vmem>>) attributes {dimension_semantics = [#tpu.dimension_semantics<parallel>], iteration_bounds = array<i64: 1>, scalar_prefetch = 0 : i64, scratch_operands = 0 : i64, tpu.core_type = #tpu.core_type<tc>, window_params = [{transform_indices = @transform_0, window_bounds = array<i64: 8, 1>}, {pipeline_mode = #tpu.pipeline_mode<synchronous>, transform_indices = @transform_1, window_bounds = array<i64: 16, 128>}, {transform_indices = @transform_2, window_bounds = array<i64: 8, 128>}]} {
    %c0 = arith.constant 0 : index
    %c0_0 = arith.constant 0 : index
    %0 = vector.load %arg1[%c0, %c0_0] : memref<8x1xi32, #tpu.memory_space<vmem>>, vector<8x1xi32>
    %1 = tpu.iota {dimensions = array<i32: 1>} : vector<8x16xi32>
    %2 = vector.broadcast %0 : vector<8x1xi32> to vector<8x16xi32>
    %3 = arith.cmpi eq, %1, %2 : vector<8x16xi32>
    %4 = arith.extui %3 : vector<8x16xi1> to vector<8x16xi32>
    %5 = arith.sitofp %4 : vector<8x16xi32> to vector<8x16xf32>
    %c0_1 = arith.constant 0 : index
    %c0_2 = arith.constant 0 : index
    %6 = vector.load %arg2[%c0_1, %c0_2] : memref<16x128xf32, #tpu.memory_space<vmem>>, vector<16x128xf32>
    %cst = arith.constant dense<0.000000e+00> : vector<8x128xf32>
    %7 = tpu.matmul %5, %6, %cst {dimension_numbers = #tpu.dot_dimension_numbers<[1], [0], [0], [1], [0, 0, 1, 1], [], []>} : vector<8x16xf32>, vector<16x128xf32>, vector<8x128xf32> -> vector<8x128xf32>
    %c0_3 = arith.constant 0 : index
    %c0_4 = arith.constant 0 : index
    %8 = vector.load %arg3[%c0_3, %c0_4] : memref<8x128xf32, #tpu.memory_space<vmem>>, vector<8x128xf32>
    tpu.vector_store %arg3[%c0_3, %c0_4], %7 {strides = array<i32>} : memref<8x128xf32, #tpu.memory_space<vmem>>, vector<8x128xf32>,
    return
  }
  func.func @transform_0(%arg0: i32) -> (i32, i32) {
    %c0_i32 = arith.constant 0 : i32
    %c0_i32_0 = arith.constant 0 : i32
    return %arg0, %c0_i32 : i32, i32
  }
  func.func @transform_1(%arg0: i32) -> (i32, i32) {
    %c0_i32 = arith.constant 0 : i32
    %c0_i32_0 = arith.constant 0 : i32
    %c0_i32_1 = arith.constant 0 : i32
    return %c0_i32, %c0_i32_0 : i32, i32
  }
  func.func @transform_2(%arg0: i32) -> (i32, i32) {
    %c0_i32 = arith.constant 0 : i32
    %c0_i32_0 = arith.constant 0 : i32
    return %arg0, %c0_i32 : i32, i32
  }
}

</mosaic_0001>

<bundles_post_ra>
// kernel: tpu_custom_call.1
= control target key start
LH: loop header
LB: loop body
LE: loop exit
PB: predicated region body
PF: predicated region fallthrough
CT: control target
= control target key end

     0   :  { %7 = vsyncpa [#allocation3], 0  ;;  %s249_s0 = inlined_call_operand.vmem [shape: s32[8,1], index: 0, kind: input, shape index: {}]   ;;  %s250_s1 = inlined_call_operand.hbm [shape: f32[16,128], index: 1, kind: input, shape index: {}]   ;;  %s251_s2 = inlined_call_operand.hbm [shape: f32[8,128], index: 2, kind: output, shape index: {}]  }
   0x1   :  { %8 = vsyncpa [#allocation4], 0  ;;  %s199_s9 = smov [#allocation2]   ;;  %s151_s13 = scalar_lea.hbm %s250_s1, 256 }
   0x2   :  { %s16_s10 = sshll.u32 %s199_s9, 4  ;;  %p152_p0 = scmp.ne.s32.totalorder %s250_s1, %s151_s13  ;;  %s17_s10 = int_to_ptr.vmem [resolvable:$true] %s16_s10 }
   0x3   :  { %p155_p1 = scmp.lt.u32.totalorder %s151_s13, %s250_s1 }
   0x5   :  { %p157_p2 = pnand %p155_p1, %p152_p0 }
   0x7   :  { %160 = shalt.err (!%p157_p2)
}
   0x8   :  { %s161_s18 = scalar_lea.vmem %s17_s10, 256  ;;  %p166_p4 = scmp.lt.s32.totalorder %s17_s10, %s17_s10 }
   0x9   :  { %p162_p3 = scmp.ne.s32.totalorder %s17_s10, %s161_s18  ;;  %p167_p5 = scmp.lt.s32.totalorder %s161_s18, %s161_s18 }
   0xb   :  { %p168_p6 = por %p167_p5, %p166_p4 }
   0xd   :  { %p169_p7 = pnand %p168_p6, %p162_p3 }
   0xf   :  { %172 = shalt.err (!%p169_p7)
}
  0x10   :  { %s200_s19 = smov 128   ;;  %s201_s20 = smov 8  }
  0x11   :  { %22 = dma.hbm_to_vmem [thread:$0]  %s250_s1, 256, %s17_s10, [#allocation3], %s200_s19, %s200_s19, %s201_s20  }
  0x12   :  { %195 = dma.done.wait [#allocation3], 256  }
  0x13   :  { %196 = vsyncadd [#allocation3], 4294967040  ;;  %v202_v0 = vmov 0   ;;  %v203_v1 = vmov 0.0|0.0   ;;  %v26_v2 = vld [vmem:[%s249_s0] sm:$0xff]  ;;  %v36_v4 = vld [vmem:[#allocation2 + $0x8] sm:$0xff]  ;;  %v27_v7 = vlaneseq }
  0x14   :  { %150 = vset.pattern.permute.xlu0 %v202_v0  ;;  %139 = vmatprep.subr.bf16.mxu0 %v203_v1  ;;  %v35_v3 = vld [vmem:[#allocation2] sm:$0xff]  ;;  %vm204_vm0 = vmmov 0   ;;  %v205_v6 = vmov 0.0   ;;  %vm37_vm1 = vcmask 130048   ;;  %s206_s1 = smov [#allocation5]  }
  0x15   :  { %30 = vperm.xlu0 %150, %v26_v2   ;;  %v140_v5 = vpack.c.bf16 %v36_v4, %v35_v3  ;;  %136 = vmatprep.mubr.msk.f32.mxu0 %vm204_vm0, %v205_v6  ;;  %v28_v8 = vand.u32 127, %v27_v7  ;;  %s118_s25 = sshll.u32 %s206_s1, 4  ;;  %s119_s25 = int_to_ptr.vmem [resolvable:$true] %s118_s25 }
  0x16   :  { %s173_s0 = scalar_lea.vmem %s119_s25, 128  ;;  %p178_p9 = scmp.lt.s32.totalorder %s119_s25, %s119_s25 }
  0x17   :  { %141 = vmatpush3.bf16.msra.mxu0 %v140_v5  ;;  %p174_p8 = scmp.ne.s32.totalorder %s119_s25, %s173_s0  ;;  %p179_p10 = scmp.lt.s32.totalorder %s173_s0, %s173_s0 }
  0x19   :  { %p180_p11 = por %p179_p10, %p178_p9 }
  0x1b   :  { %p181_p12 = pnand %p180_p11, %p174_p8 }
  0x94   :  { %v31_v9 = vpop.permute.xlu0 %30 }
  0x95   :  { %vm32_vm2 = vcmp.eq.s32.totalorder %v28_v8, %v31_v9 }
  0x96   :  { %v127_v10 = vsel %vm32_vm2, 1.0, %v205_v6 }
  0x97   :  { %137 = vmatmul.mubr.msk.f32.vlgmr.msra.gmra.mrb[0].mxu0 %vm37_vm1, %v127_v10 }
 0x16a   :  { %v107_v11 = vpop.f32.mrb[0].mxu0 }
 0x16b   :  { %111 = vst [vmem:[#allocation5] sm:$0xff] %v107_v11  ;;  %v138_v12 = vpop.f32.mrb[1].mxu0 }
 0x16c   :  { %184 = shalt.err (!%p181_p12)
}
 0x16d   :  { %s185_s28 = scalar_lea.hbm %s251_s2, 128 }
 0x16e   :  { %p186_p13 = scmp.ne.s32.totalorder %s251_s2, %s185_s28  ;;  %p189_p0 = scmp.lt.u32.totalorder %s185_s28, %s251_s2 }
 0x170   :  { %p191_p1 = pnand %p189_p0, %p186_p13 }
 0x172   :  { %194 = shalt.err (!%p191_p1)
}
 0x173   :  { %121 = dma.vmem_to_hbm [thread:$0]  %s119_s25, 128, %s251_s2, [#allocation4]  }
 0x174   :  { %197 = dma.done.wait [#allocation4], 128  }
 0x175   :  { %198 = vsyncadd [#allocation4], 4294967168 }
 0x176   :  { %125 = vsyncpa [#allocation3], 1 }
 0x177   :  { %126 = vsyncpa [#allocation4], 1 }

</bundles_post_ra>
